<compile_context>
chip_gen: v6e
topology: v6e:2x2x1
jax: 0.10.0
libtpu: 0.0.40
codegen_flags: <defaults>
</compile_context>

<pallas_src>
import functools

import jax
import jax.numpy as jnp
from jax.experimental import pallas as pl
from jax.experimental.pallas import tpu as pltpu


def _round_up(n, m):
    return (n + m - 1) // m * m


def _cdiv(a, b):
    return (a + b - 1) // b


def _feature_pad(d):
    """Lane-align a feature dim; prefer 256 (v6e/v7x MXU) when cheap."""
    p128 = _round_up(d, 128)
    p256 = _round_up(d, 256)
    return p256 if p256 <= 1.25 * p128 else p128


def _resident_spec(shape):
    """BlockSpec for an operand that stays resident across all grid steps."""
    idx = lambda i: (0,) * len(shape)
    try:
        # Constant index_map never re-DMAs; single buffer halves its VMEM.
        return pl.BlockSpec(shape, idx, pipeline_mode=pl.Buffered(1))
    except (TypeError, AttributeError):
        return pl.BlockSpec(shape, idx)


def mlp_kernel(x_ref, w1_ref, b1_ref, w2_ref, b2_ref, o_ref, *, h_chunk):
    """out = relu(x @ w1 + b1) @ w2 + b2, hidden dim consumed in chunks."""
    x = x_ref[...]                                   # (TB, Din_p) bf16
    h_total = w1_ref.shape[1]
    acc = jnp.zeros(o_ref.shape, jnp.float32)        # (TB, Dout_p) f32
    for h0 in range(0, h_total, h_chunk):
        # fc1 slice on the MXU, f32 accumulation.
        h = jnp.dot(x, w1_ref[:, h0:h0 + h_chunk],
                    preferred_element_type=jnp.float32)
        # Bias + ReLU in f32 on the VPU.
        h = jnp.maximum(h + b1_ref[:, h0:h0 + h_chunk], 0.0)
        # fc2 slice; cast activations back to bf16 for the MXU.
        acc = acc + jnp.dot(h.astype(w2_ref.dtype),
                            w2_ref[h0:h0 + h_chunk, :],
                            preferred_element_type=jnp.float32)
    o_ref[...] = (acc + b2_ref[...]).astype(o_ref.dtype)


def prepare_params(w1, b1, w2, b2):
    """Pad + cast weights ONCE (off the per-call hot path).

    Weights are stored pre-transposed as [in, out], so the kernel computes
    x @ W + b, matching PyTorch's x @ W.T + b.
    """
    Din, H = w1.shape
    Dout = w2.shape[1]
    Din_p, H_p, Dout_p = _feature_pad(Din), _feature_pad(H), _feature_pad(Dout)

    w1_p = jnp.zeros((Din_p, H_p), jnp.bfloat16).at[:Din, :H].set(
        w1.astype(jnp.bfloat16))
    w2_p = jnp.zeros((H_p, Dout_p), jnp.bfloat16).at[:H, :Dout].set(
        w2.astype(jnp.bfloat16))
    b1_p = jnp.zeros((1, H_p), jnp.float32).at[0, :H].set(
        b1.astype(jnp.float32))
    b2_p = jnp.zeros((1, Dout_p), jnp.float32).at[0, :Dout].set(
        b2.astype(jnp.float32))
    return (w1_p, b1_p, w2_p, b2_p), (Din, H, Dout)


@functools.partial(jax.jit, static_argnames=("dim_out", "block_batch"))
def mlp_regression_forward(x, w1_p, b1_p, w2_p, b2_p, *, dim_out,
                           block_batch=512):
    """x: [B, Din] (any float dtype); padded bf16/f32 params from prepare_params."""
    B, Din = x.shape
    Din_p, H_p = w1_p.shape
    Dout_p = w2_p.shape[1]
    out_dtype = x.dtype
    out_isize = jnp.dtype(out_dtype).itemsize

    # --- batch tiling: balanced tiles; >=2 programs when possible so the
    # "parallel" axis shards across v7x's 2 TensorCores (no-op on v5e/v6e).
    SUB = 16                                  # bf16 sublane packing
    min_tiles = 2 if B >= 2 * SUB else 1
    n_tiles = max(_cdiv(B, block_batch), min_tiles)
    TB = _round_up(_cdiv(B, n_tiles), SUB)
    B_p = _round_up(B, TB)
    grid = (B_p // TB,)

    # --- pad input (batch to TB multiple, features to lane alignment).
    x_p = jnp.zeros((B_p, Din_p), jnp.bfloat16).at[:B, :Din].set(
        x.astype(jnp.bfloat16))

    # --- hidden-dim chunking: avoid a huge (TB, H_p) f32 + bf16 scratch.
    if TB * H_p * 6 > 4 * 1024 * 1024:
        h_chunk = 128
        for c in range(min(H_p, 1024), 0, -128):
            if H_p % c == 0:
                h_chunk = c
                break
    else:
        h_chunk = H_p

    # --- VMEM plan: single-buffered resident weights, double-buffered x/out
    # streams, plus in-kernel activation scratch. Budget per generation.
    resident = (Din_p * H_p + H_p * Dout_p) * 2 + (H_p + Dout_p) * 4
    stream = 2 * TB * Din_p * 2 + 2 * TB * Dout_p * out_isize
    scratch = TB * h_chunk * 6 + TB * Dout_p * 4 + TB * Din_p * 2
    vmem_bytes = resident + stream + scratch
    try:
        vmem_cap = int(pltpu.get_tpu_info().vmem_capacity_bytes)
    except Exception:
        vmem_cap = 64 * 1024 * 1024           # safe floor for all generations
    vmem_limit = int(min(max(int(1.25 * vmem_bytes), 16 * 1024 * 1024),
                         int(0.9 * vmem_cap)))

    cost = pl.CostEstimate(
        flops=2 * B_p * (Din_p * H_p + H_p * Dout_p),
        transcendentals=0,
        bytes_accessed=(x_p.size * 2 + w1_p.size * 2 + w2_p.size * 2
                        + b1_p.size * 4 + b2_p.size * 4
                        + B_p * Dout_p * out_isize),
    )

    out_p = pl.pallas_call(
        functools.partial(mlp_kernel, h_chunk=h_chunk),
        out_shape=jax.ShapeDtypeStruct((B_p, Dout_p), out_dtype),
        grid_spec=pltpu.PrefetchScalarGridSpec(
            num_scalar_prefetch=0,
            grid=grid,
            in_specs=[
                pl.BlockSpec((TB, Din_p), lambda i: (i, 0)),   # x tile (streamed)
                _resident_spec((Din_p, H_p)),                  # w1 resident
                _resident_spec((1, H_p)),                      # b1 resident
                _resident_spec((H_p, Dout_p)),                 # w2 resident
                _resident_spec((1, Dout_p)),                   # b2 resident
            ],
            out_specs=pl.BlockSpec((TB, Dout_p), lambda i: (i, 0)),
        ),
        compiler_params=pltpu.CompilerParams(
            dimension_semantics=("parallel",),
            vmem_limit_bytes=vmem_limit,
        ),
        cost_estimate=cost,
    )(x_p, w1_p, b1_p, w2_p, b2_p)

    return out_p[:B, :dim_out]


def init_params(key, dim_input, dim_hidden, dim_out):
    """Deterministic init mimicking nn.Linear default (uniform +/- 1/sqrt(fan_in)).

    Returned weights are already transposed to [in, out] layout.
    """
    k1, k2, k3, k4 = jax.random.split(key, 4)
    lim1 = 1.0 / jnp.sqrt(dim_input)
    lim2 = 1.0 / jnp.sqrt(dim_hidden)
    w1 = jax.random.uniform(k1, (dim_input, dim_hidden), jnp.float32, -lim1, lim1)
    b1 = jax.random.uniform(k2, (dim_hidden,), jnp.float32, -lim1, lim1)
    w2 = jax.random.uniform(k3, (dim_hidden, dim_out), jnp.float32, -lim2, lim2)
    b2 = jax.random.uniform(k4, (dim_out,), jnp.float32, -lim2, lim2)
    return w1, b1, w2, b2


# TODO(synk): MLPRegression.loss (mse_loss) is not part of forward(); if needed
# it is just jnp.mean((preds - labels) ** 2) and does not warrant a kernel.

if __name__ == "__main__":
    key = jax.random.PRNGKey(0)
    kx, kp = jax.random.split(key)

    batch, dim_input, dim_hidden, dim_out = 8, 32, 64, 16
    x = jax.random.normal(kx, (batch, dim_input), jnp.float32)
    w1, b1, w2, b2 = init_params(kp, dim_input, dim_hidden, dim_out)

    # One-time (off the hot path) weight padding + bf16 cast.
    (w1_p, b1_p, w2_p, b2_p), (_, _, dout) = prepare_params(w1, b1, w2, b2)

    out = mlp_regression_forward(x, w1_p, b1_p, w2_p, b2_p, dim_out=dout)
    out = jax.block_until_ready(out)

    # Reference check against plain f32 JAX (same math as the PyTorch forward).
    # Loose tolerance accounts for bf16 MXU operands (f32 accumulation).
    ref = jnp.maximum(x @ w1 + b1, 0.0) @ w2 + b2
    assert out.shape == (batch, dim_out)
    assert jnp.allclose(out, ref, atol=5e-2, rtol=5e-2), \
        f"max abs err = {float(jnp.max(jnp.abs(out - ref)))}"

    print("KERNEL_OK")
</pallas_src>

<mosaic_0001>
module attributes {stable_mosaic.version = 11 : i64} {
  func.func @mlp_kernel(%arg0: i32, %arg1: memref<16x128xbf16, #tpu.memory_space<vmem>>, %arg2: memref<128x128xbf16, #tpu.memory_space<vmem>>, %arg3: memref<1x128xf32, #tpu.memory_space<vmem>>, %arg4: memref<128x128xbf16, #tpu.memory_space<vmem>>, %arg5: memref<1x128xf32, #tpu.memory_space<vmem>>, %arg6: memref<16x128xf32, #tpu.memory_space<vmem>>) attributes {dimension_semantics = [#tpu.dimension_semantics<parallel>], iteration_bounds = array<i64: 1>, scalar_prefetch = 0 : i64, scratch_operands = 0 : i64, tpu.core_type = #tpu.core_type<tc>, window_params = [{transform_indices = @transform_0, window_bounds = array<i64: 16, 128>}, {pipeline_mode = #tpu.pipeline_mode<synchronous>, transform_indices = @transform_1, window_bounds = array<i64: 128, 128>}, {pipeline_mode = #tpu.pipeline_mode<synchronous>, transform_indices = @transform_2, window_bounds = array<i64: 1, 128>}, {pipeline_mode = #tpu.pipeline_mode<synchronous>, transform_indices = @transform_3, window_bounds = array<i64: 128, 128>}, {pipeline_mode = #tpu.pipeline_mode<synchronous>, transform_indices = @transform_4, window_bounds = array<i64: 1, 128>}, {transform_indices = @transform_5, window_bounds = array<i64: 16, 128>}]} {
    %c0 = arith.constant 0 : index
    %c0_0 = arith.constant 0 : index
    %0 = vector.load %arg1[%c0, %c0_0] : memref<16x128xbf16, #tpu.memory_space<vmem>>, vector<16x128xbf16>
    %cst = arith.constant 0.000000e+00 : f32
    %1 = vector.broadcast %cst : f32 to vector<16x128xf32>
    %c0_1 = arith.constant 0 : index
    %c0_2 = arith.constant 0 : index
    %2 = vector.load %arg2[%c0_1, %c0_2] : memref<128x128xbf16, #tpu.memory_space<vmem>>, vector<128x128xbf16>
    %cst_3 = arith.constant dense<0.000000e+00> : vector<16x128xf32>
    %3 = tpu.matmul %0, %2, %cst_3 {dimension_numbers = #tpu.dot_dimension_numbers<[1], [0], [0], [1], [0, 0, 1, 1], [], []>} : vector<16x128xbf16>, vector<128x128xbf16>, vector<16x128xf32> -> vector<16x128xf32>
    %c0_4 = arith.constant 0 : index
    %c0_5 = arith.constant 0 : index
    %4 = vector.load %arg3[%c0_4, %c0_5] : memref<1x128xf32, #tpu.memory_space<vmem>>, vector<1x128xf32>
    %5 = vector.broadcast %4 : vector<1x128xf32> to vector<16x128xf32>
    %6 = arith.addf %3, %5 : vector<16x128xf32>
    %cst_6 = arith.constant 0.000000e+00 : f32
    %7 = vector.broadcast %cst_6 : f32 to vector<16x128xf32>
    %8 = arith.maximumf %6, %7 : vector<16x128xf32>
    %9 = arith.truncf %8 : vector<16x128xf32> to vector<16x128xbf16>
    %c0_7 = arith.constant 0 : index
    %c0_8 = arith.constant 0 : index
    %10 = vector.load %arg4[%c0_7, %c0_8] : memref<128x128xbf16, #tpu.memory_space<vmem>>, vector<128x128xbf16>
    %cst_9 = arith.constant dense<0.000000e+00> : vector<16x128xf32>
    %11 = tpu.matmul %9, %10, %cst_9 {dimension_numbers = #tpu.dot_dimension_numbers<[1], [0], [0], [1], [0, 0, 1, 1], [], []>} : vector<16x128xbf16>, vector<128x128xbf16>, vector<16x128xf32> -> vector<16x128xf32>
    %12 = arith.addf %1, %11 : vector<16x128xf32>
    %c0_10 = arith.constant 0 : index
    %c0_11 = arith.constant 0 : index
    %13 = vector.load %arg5[%c0_10, %c0_11] : memref<1x128xf32, #tpu.memory_space<vmem>>, vector<1x128xf32>
    %14 = vector.broadcast %13 : vector<1x128xf32> to vector<16x128xf32>
    %15 = arith.addf %12, %14 : vector<16x128xf32>
    %c0_12 = arith.constant 0 : index
    %c0_13 = arith.constant 0 : index
    %16 = vector.load %arg6[%c0_12, %c0_13] : memref<16x128xf32, #tpu.memory_space<vmem>>, vector<16x128xf32>
    tpu.vector_store %arg6[%c0_12, %c0_13], %15 {strides = array<i32>} : memref<16x128xf32, #tpu.memory_space<vmem>>, vector<16x128xf32>,
    return
  }
  func.func @transform_0(%arg0: i32) -> (i32, i32) {
    %c0_i32 = arith.constant 0 : i32
    %c0_i32_0 = arith.constant 0 : i32
    return %arg0, %c0_i32 : i32, i32
  }
  func.func @transform_1(%arg0: i32) -> (i32, i32) {
    %c0_i32 = arith.constant 0 : i32
    %c0_i32_0 = arith.constant 0 : i32
    %c0_i32_1 = arith.constant 0 : i32
    return %c0_i32, %c0_i32_0 : i32, i32
  }
  func.func @transform_2(%arg0: i32) -> (i32, i32) {
    %c0_i32 = arith.constant 0 : i32
    %c0_i32_0 = arith.constant 0 : i32
    %c0_i32_1 = arith.constant 0 : i32
    return %c0_i32, %c0_i32_0 : i32, i32
  }
  func.func @transform_3(%arg0: i32) -> (i32, i32) {
    %c0_i32 = arith.constant 0 : i32
    %c0_i32_0 = arith.constant 0 : i32
    %c0_i32_1 = arith.constant 0 : i32
    return %c0_i32, %c0_i32_0 : i32, i32
  }
  func.func @transform_4(%arg0: i32) -> (i32, i32) {
    %c0_i32 = arith.constant 0 : i32
    %c0_i32_0 = arith.constant 0 : i32
    %c0_i32_1 = arith.constant 0 : i32
    return %c0_i32, %c0_i32_0 : i32, i32
  }
  func.func @transform_5(%arg0: i32) -> (i32, i32) {
    %c0_i32 = arith.constant 0 : i32
    %c0_i32_0 = arith.constant 0 : i32
    return %arg0, %c0_i32 : i32, i32
  }
}

</mosaic_0001>

<bundles_post_ra>
// kernel: mlp_regression_forward.1
= control target key start
LH: loop header
LB: loop body
LE: loop exit
PB: predicated region body
PF: predicated region fallthrough
CT: control target
= control target key end

     0   :  { %10 = vsyncpa [#allocation3], 0  ;;  %s493_s0 = inlined_call_operand.vmem [shape: bf16[16,128], index: 0, kind: input, shape index: {}]   ;;  %s494_s1 = inlined_call_operand.hbm [shape: bf16[128,128], index: 1, kind: input, shape index: {}]   ;;  %s495_s2 = inlined_call_operand.vmem [shape: f32[1,128], index: 2, kind: input, shape index: {}]   ;;  %s496_s3 = inlined_call_operand.hbm [shape: bf16[128,128], index: 3, kind: input, shape index: {}]   ;;  %s497_s4 = inlined_call_operand.vmem [shape: f32[1,128], index: 4, kind: input, shape index: {}]   ;;  %s498_s5 = inlined_call_operand.vmem [shape: f32[16,128], index: 5, kind: output, shape index: {}]  }
   0x1   :  { %11 = vsyncpa [#allocation5], 0  ;;  %s436_s18 = smov [#allocation2]  }
   0x2   :  { %s19_s19 = sshll.u32 %s436_s18, 4  ;;  %s20_s19 = int_to_ptr.vmem [resolvable:$true] %s19_s19 }
   0x3   :  { %s400_s20 = scalar_lea.vmem %s20_s19, 1024  ;;  %p405_p1 = scmp.lt.s32.totalorder %s20_s19, %s20_s19 }
   0x4   :  { %p401_p0 = scmp.ne.s32.totalorder %s20_s19, %s400_s20  ;;  %p406_p2 = scmp.lt.s32.totalorder %s400_s20, %s400_s20 }
   0x6   :  { %p407_p3 = por %p406_p2, %p405_p1 }
   0x8   :  { %p408_p4 = pnand %p407_p3, %p401_p0 }
   0xa   :  { %411 = shalt.err (!%p408_p4)
}
   0xb   :  { %s437_s21 = smov 64   ;;  %s438_s22 = smov 4  }
   0xc   :  { %25 = dma.hbm_to_vmem [thread:$0]  %s494_s1, 1024, %s20_s19, [#allocation3], %s437_s21, %s437_s21, %s438_s22  }
   0xd   :  { %s439_s25 = smov [#allocation4]  }
   0xe   :  { %s33_s26 = sshll.u32 %s439_s25, 4  ;;  %s34_s26 = int_to_ptr.vmem [resolvable:$true] %s33_s26 }
   0xf   :  { %s420_s27 = scalar_lea.vmem %s34_s26, 1024  ;;  %p425_p6 = scmp.lt.s32.totalorder %s34_s26, %s34_s26 }
  0x10   :  { %p421_p5 = scmp.ne.s32.totalorder %s34_s26, %s420_s27  ;;  %p426_p7 = scmp.lt.s32.totalorder %s420_s27, %s420_s27 }
  0x12   :  { %p427_p8 = por %p426_p7, %p425_p6 }
  0x14   :  { %p428_p9 = pnand %p427_p8, %p421_p5 }
  0x16   :  { %431 = shalt.err (!%p428_p9)
}
  0x17   :  { %39 = dma.hbm_to_vmem [thread:$0]  %s496_s3, 1024, %s34_s26, [#allocation5], %s437_s21, %s437_s21, %s438_s22  }
  0x18   :  { %432 = dma.done.wait [#allocation3], 1024  }
  0x19   :  { %433 = vsyncadd [#allocation3], 4294966272 }
  0x1a   :  { %434 = dma.done.wait [#allocation5], 1024  }
  0x1b   :  { %435 = vsyncadd [#allocation5], 4294966272  ;;  %v440_v0 = vmov 0.0   ;;  %vm441_vm0 = vmmov 0   ;;  %v375_v1 = vld [vmem:[#allocation2 + $0x38] sm:$0xff]   ;;  %v376_v2 = vld [vmem:[#allocation2 + $0x30] sm:$0xff]  }
  0x1c   :  { %329 = vmatprep.subr.bf16.mxu0 %v440_v0  ;;  %345 = vmatprep.mubr.msk.bf16.mxu0 %vm441_vm0, %v440_v0  ;;  %v377_v3 = vld [vmem:[#allocation2 + $0x28] sm:$0xff]   ;;  %v384_v4 = vld [vmem:[#allocation4 + $0x38] sm:$0xff]   ;;  %v378_v5 = vld [vmem:[#allocation2 + $0x20] sm:$0xff]  }
  0x1d   :  { %349 = vmatprep.subr.bf16.mxu1 %v440_v0  ;;  %365 = vmatprep.mubr.msk.bf16.mxu1 %vm441_vm0, %v440_v0  ;;  %v385_v6 = vld [vmem:[#allocation4 + $0x30] sm:$0xff]   ;;  %v379_v7 = vld [vmem:[#allocation2 + $0x18] sm:$0xff]   ;;  %v386_v8 = vld [vmem:[#allocation4 + $0x28] sm:$0xff]  }
  0x1e   :  { %330 = vmatpush3.bf16.msra.mxu0 %v375_v1  ;;  %350 = vmatpush3.bf16.msra.mxu1 %v384_v4  ;;  %v380_v9 = vld [vmem:[#allocation2 + $0x10] sm:$0xff]   ;;  %v387_v10 = vld [vmem:[#allocation4 + $0x20] sm:$0xff]   ;;  %v381_v11 = vld [vmem:[#allocation2 + $0x8] sm:$0xff]  }
  0x1f   :  { %331 = vmatprep.subr.bf16.mxu0 %v440_v0  ;;  %351 = vmatprep.subr.bf16.mxu1 %v440_v0  ;;  %v388_v12 = vld [vmem:[#allocation4 + $0x18] sm:$0xff]   ;;  %v382_v13 = vld [vmem:[#allocation2] sm:$0xff]   ;;  %v389_v15 = vld [vmem:[#allocation4 + $0x10] sm:$0xff]  }
  0x20   :  { %v383_v14 = vld [vmem:[%s493_s0] sm:$0xff]   ;;  %v390_v16 = vld [vmem:[#allocation4 + $0x8] sm:$0xff]  }
  0x21   :  { %v391_v17 = vld [vmem:[#allocation4] sm:$0xff]  }
  0x22   :  { %332 = vmatpush3.bf16.msra.mxu0 %v376_v2  ;;  %352 = vmatpush3.bf16.msra.mxu1 %v385_v6  ;;  %v292_v18 = vld [vmem:[%s495_s2] ss:$0 sm:$0xff] }
  0x23   :  { %333 = vmatprep.subr.bf16.mxu0 %v440_v0  ;;  %353 = vmatprep.subr.bf16.mxu1 %v440_v0  ;;  %v302_v28 = vld [vmem:[%s497_s4] ss:$0 sm:$0xff] }
  0x26   :  { %334 = vmatpush3.bf16.msra.mxu0 %v377_v3  ;;  %354 = vmatpush3.bf16.msra.mxu1 %v386_v8 }
  0x27   :  { %335 = vmatprep.subr.bf16.mxu0 %v440_v0  ;;  %355 = vmatprep.subr.bf16.mxu1 %v440_v0 }
  0x2a   :  { %336 = vmatpush3.bf16.msra.mxu0 %v378_v5  ;;  %356 = vmatpush3.bf16.msra.mxu1 %v387_v10 }
  0x2b   :  { %337 = vmatprep.subr.bf16.mxu0 %v440_v0  ;;  %357 = vmatprep.subr.bf16.mxu1 %v440_v0 }
  0x2e   :  { %338 = vmatpush3.bf16.msra.mxu0 %v379_v7  ;;  %358 = vmatpush3.bf16.msra.mxu1 %v388_v12 }
  0x2f   :  { %339 = vmatprep.subr.bf16.mxu0 %v440_v0  ;;  %359 = vmatprep.subr.bf16.mxu1 %v440_v0 }
  0x32   :  { %340 = vmatpush3.bf16.msra.mxu0 %v380_v9  ;;  %360 = vmatpush3.bf16.msra.mxu1 %v389_v15 }
  0x33   :  { %341 = vmatprep.subr.bf16.mxu0 %v440_v0  ;;  %361 = vmatprep.subr.bf16.mxu1 %v440_v0 }
  0x36   :  { %342 = vmatpush3.bf16.msra.mxu0 %v381_v11  ;;  %362 = vmatpush3.bf16.msra.mxu1 %v390_v16 }
  0x37   :  { %343 = vmatprep.subr.bf16.mxu0 %v440_v0  ;;  %363 = vmatprep.subr.bf16.mxu1 %v440_v0 }
  0x3a   :  { %344 = vmatpush3.bf16.msra.mxu0 %v382_v13  ;;  %364 = vmatpush3.bf16.msra.mxu1 %v391_v17 }
  0x3d   :  { %346 = vmatmul.mubr.bf16.vlgmr.msra.gmra.mxu0 %v383_v14 }
  0xfd   :  { %v162_v19 = vpop.f32.mrf.mxu0 }
  0xfe   :  { %v163_v21 = vadd.f32 %v292_v18, %v162_v19 }
  0xff   :  { %v347_v20 = vpop.f32.mrf.mxu0 }
 0x100   :  { %v169_v25 = vmax.f32 %v163_v21, 0.0 }
 0x101   :  { %v165_v22 = vpop.f32.mrf.mxu0 }
 0x102   :  { %v166_v23 = vadd.f32 %v292_v18, %v165_v22 }
 0x103   :  { %v348_v24 = vpop.f32.mrf.mxu0 }
 0x104   :  { %v170_v26 = vmax.f32 %v166_v23, 0.0 }
 0x106   :  { %v171_v27 = vpack.c.bf16 %v170_v26, %v169_v25 }
 0x108   :  { %366 = vmatmul.mubr.bf16.vlgmr.msra.gmra.mxu1 %v171_v27 }
 0x1c8   :  { %v277_v29 = vpop.f32.mrf.mxu1 }
 0x1c9   :  { %v278_v30 = vadd.f32 %v302_v28, %v277_v29 }
 0x1ca   :  { %v367_v31 = vpop.f32.mrf.mxu1 }
 0x1cb   :  { %284 = vst [vmem:[%s498_s5] sm:$0xff] %v278_v30 }
 0x1cc   :  { %v280_v32 = vpop.f32.mrf.mxu1 }
 0x1cd   :  { %v281_v33 = vadd.f32 %v302_v28, %v280_v32 }
 0x1ce   :  { %v368_v34 = vpop.f32.mrf.mxu1 }
 0x1cf   :  { %285 = vst [vmem:[%s498_s5 + $0x8] sm:$0xff] %v281_v33 }
 0x1d0   :  { %290 = vsyncpa [#allocation3], 1 }
 0x1d1   :  { %291 = vsyncpa [#allocation5], 1 }

</bundles_post_ra>
